<compile_context>
chip_gen: v6e
topology: v6e:2x2x1
jax: 0.10.0
libtpu: 0.0.40
codegen_flags: <defaults>
</compile_context>

<pallas_src>
import functools

import jax
import jax.numpy as jnp
from jax.experimental import pallas as pl
from jax.experimental.pallas import tpu as pltpu

LANE = 128
SUBLANE = 8
MAX_BLOCK_ROWS = 2048  # (2048, 128) f32 tile = 1 MiB per input per buffer


def _sigloss_partial_kernel(pred_ref, gt_ref, out_ref, *, n_elems, block_rows,
                            valid_mask, max_depth):
    """One grid step: reduce a (block_rows, LANE) tile to partial moments.

    out_ref: (1, 3, 8, LANE) holding [sum g, sum g*g, valid count] tiles.
    """
    i = pl.program_id(0)

    pred = pred_ref[...].astype(jnp.float32)
    gt = gt_ref[...].astype(jnp.float32)

    # Mask wrapper padding / ragged last block via the global element index.
    base = i * (block_rows * LANE)
    rid = jax.lax.broadcasted_iota(jnp.int32, (block_rows, LANE), 0)
    cid = jax.lax.broadcasted_iota(jnp.int32, (block_rows, LANE), 1)
    idx = base + rid * LANE + cid
    m = (idx < n_elems).astype(jnp.float32)

    if valid_mask:
        v = gt > 0.0
        if max_depth is not None:
            v = jnp.logical_and(v, gt <= max_depth)
        m = m * v.astype(jnp.float32)

    ok = m > 0.0
    # Guard logs on masked-out / padded elements (may hold zeros or garbage).
    g = (jnp.log(jnp.where(ok, pred, 1.0)) -
         jnp.log(jnp.where(ok, gt, 1.0))) * m

    def tile_sum(x):  # (block_rows, LANE) -> (8, LANE); pure VPU vreg adds
        return jnp.sum(x.reshape(-1, SUBLANE, LANE), axis=0)

    out_ref[0, 0, :, :] = tile_sum(g)
    out_ref[0, 1, :, :] = tile_sum(g * g)
    out_ref[0, 2, :, :] = tile_sum(m)


def sigloss(depth_pred, depth_gt, *, valid_mask=False, loss_weight=1.0,
            max_depth=None, max_block_rows=MAX_BLOCK_ROWS):
    """JAX/Pallas equivalent of SigLoss.forward (returns a scalar f32)."""
    dtype = jnp.promote_types(depth_pred.dtype, depth_gt.dtype)
    if not jnp.issubdtype(dtype, jnp.floating):
        dtype = jnp.float32
    pred = depth_pred.astype(dtype).reshape(-1)
    gt = depth_gt.astype(dtype).reshape(-1)
    n = pred.shape[0]

    # Pad (only if needed) to the (8, 128) layout granule; the padded tail is
    # masked inside the kernel via the static element count `n`.
    granule = SUBLANE * LANE
    n_pad = ((n + granule - 1) // granule) * granule
    if n_pad != n:
        pred = jnp.pad(pred, (0, n_pad - n))
        gt = jnp.pad(gt, (0, n_pad - n))

    rows = n_pad // LANE
    block_rows = min(int(max_block_rows), rows)
    num_blocks = pl.cdiv(rows, block_rows)

    pred2 = pred.reshape(rows, LANE)
    gt2 = gt.reshape(rows, LANE)

    kernel = functools.partial(
        _sigloss_partial_kernel,
        n_elems=n,
        block_rows=block_rows,
        valid_mask=valid_mask,
        max_depth=None if max_depth is None else float(max_depth),
    )

    parts = pl.pallas_call(
        kernel,
        out_shape=jax.ShapeDtypeStruct((num_blocks, 3, SUBLANE, LANE),
                                       jnp.float32),
        grid=(num_blocks,),
        in_specs=[
            pl.BlockSpec((block_rows, LANE), lambda i: (i, 0)),
            pl.BlockSpec((block_rows, LANE), lambda i: (i, 0)),
        ],
        out_specs=pl.BlockSpec((1, 3, SUBLANE, LANE), lambda i: (i, 0, 0, 0)),
        compiler_params=pltpu.CompilerParams(
            dimension_semantics=("parallel",)),
    )(pred2, gt2)

    sum_g = jnp.sum(parts[:, 0])
    sum_g2 = jnp.sum(parts[:, 1])
    # Per-element partial counts are exact small integers in f32; sum them as
    # int32 so the total stays exact even beyond 2^24 valid pixels.
    cnt = jnp.sum(parts[:, 2].astype(jnp.int32)).astype(jnp.float32)

    # NOTE: like torch.var (unbiased), cnt <= 1 yields inf/NaN.
    mean = sum_g / cnt
    var = (sum_g2 - cnt * mean * mean) / (cnt - 1.0)
    var = jnp.maximum(var, 0.0)  # guard tiny negative from cancellation
    dg = var + 0.15 * mean * mean
    return (loss_weight * jnp.sqrt(dg)).astype(jnp.float32)


def sigloss_ref(pred, gt, *, valid_mask=False, loss_weight=1.0,
                max_depth=None):
    """Pure-JAX reference matching the PyTorch module."""
    pred = pred.astype(jnp.float32)
    gt = gt.astype(jnp.float32)
    if valid_mask:
        m = gt > 0
        if max_depth is not None:
            m = jnp.logical_and(m, gt <= max_depth)
    else:
        m = jnp.ones_like(gt, dtype=bool)
    cnt = jnp.sum(m).astype(jnp.float32)
    g = jnp.log(jnp.where(m, pred, 1.0)) - jnp.log(jnp.where(m, gt, 1.0))
    g = jnp.where(m, g, 0.0)
    mean = jnp.sum(g) / cnt
    var = jnp.sum(jnp.where(m, (g - mean) ** 2, 0.0)) / (cnt - 1.0)
    dg = var + 0.15 * mean * mean
    return loss_weight * jnp.sqrt(dg)


if __name__ == "__main__":
    key = jax.random.PRNGKey(0)
    k1, k2, k3, k4, k5 = jax.random.split(key, 5)

    # Test 1: NCHW depth maps with valid-mask filtering (single block).
    shape = (2, 1, 16, 16)
    max_depth = 10.0
    depth_pred = jax.random.uniform(k1, shape, jnp.float32, 0.5, 9.5)
    depth_gt = jax.random.uniform(k2, shape, jnp.float32, 0.5, 12.0)
    drop = jax.random.bernoulli(k3, 0.2, shape)
    depth_gt = jnp.where(drop, 0.0, depth_gt)

    loss = sigloss(depth_pred, depth_gt, valid_mask=True, loss_weight=1.0,
                   max_depth=max_depth)
    loss = jax.block_until_ready(loss)
    ref = sigloss_ref(depth_pred, depth_gt, valid_mask=True, loss_weight=1.0,
                      max_depth=max_depth)
    assert jnp.allclose(loss, ref, rtol=1e-4, atol=1e-6), (loss, ref)

    # Test 2: no valid-mask, small block override -> multi-block "parallel"
    # grid with a ragged last block (exercises the in-kernel index mask).
    shape2 = (1, 1, 40, 64)
    pred_b = jax.random.uniform(k4, shape2, jnp.float32, 0.5, 9.5)
    gt_b = jax.random.uniform(k5, shape2, jnp.float32, 0.5, 12.0)
    loss2 = sigloss(pred_b, gt_b, valid_mask=False, loss_weight=0.5,
                    max_block_rows=16)
    loss2 = jax.block_until_ready(loss2)
    ref2 = sigloss_ref(pred_b, gt_b, valid_mask=False, loss_weight=0.5)
    assert jnp.allclose(loss2, ref2, rtol=1e-4, atol=1e-6), (loss2, ref2)

    print("KERNEL_OK")
</pallas_src>

<mosaic_0001>
module attributes {stable_mosaic.version = 11 : i64} {
  func.func @_sigloss_partial_kernel(%arg0: i32, %arg1: memref<8x128xf32, #tpu.memory_space<vmem>>, %arg2: memref<8x128xf32, #tpu.memory_space<vmem>>, %arg3: memref<1x3x8x128xf32, #tpu.memory_space<vmem>>) attributes {dimension_semantics = [#tpu.dimension_semantics<parallel>], iteration_bounds = array<i64: 1>, scalar_prefetch = 0 : i64, scratch_operands = 0 : i64, tpu.core_type = #tpu.core_type<tc>, window_params = [{transform_indices = @transform_0, window_bounds = array<i64: 8, 128>}, {transform_indices = @transform_1, window_bounds = array<i64: 8, 128>}, {transform_indices = @transform_2, window_bounds = array<i64: 1, 3, 8, 128>}]} {
    %c0 = arith.constant 0 : index
    %c0_0 = arith.constant 0 : index
    %0 = vector.load %arg1[%c0, %c0_0] : memref<8x128xf32, #tpu.memory_space<vmem>>, vector<8x128xf32>
    %c0_1 = arith.constant 0 : index
    %c0_2 = arith.constant 0 : index
    %1 = vector.load %arg2[%c0_1, %c0_2] : memref<8x128xf32, #tpu.memory_space<vmem>>, vector<8x128xf32>
    %c1024_i32 = arith.constant 1024 : i32
    %2 = arith.muli %arg0, %c1024_i32 : i32
    %3 = tpu.iota {dimensions = array<i32: 0>} : vector<8x128xi32>
    %4 = tpu.iota {dimensions = array<i32: 1>} : vector<8x128xi32>
    %c128_i32 = arith.constant 128 : i32
    %5 = vector.broadcast %c128_i32 : i32 to vector<8x128xi32>
    %6 = arith.muli %3, %5 : vector<8x128xi32>
    %7 = vector.broadcast %2 : i32 to vector<8x128xi32>
    %8 = arith.addi %7, %6 : vector<8x128xi32>
    %9 = arith.addi %8, %4 : vector<8x128xi32>
    %c512_i32 = arith.constant 512 : i32
    %10 = vector.broadcast %c512_i32 : i32 to vector<8x128xi32>
    %11 = arith.cmpi slt, %9, %10 : vector<8x128xi32>
    %12 = arith.extui %11 : vector<8x128xi1> to vector<8x128xi32>
    %13 = arith.sitofp %12 : vector<8x128xi32> to vector<8x128xf32>
    %cst = arith.constant 0.000000e+00 : f32
    %14 = vector.broadcast %cst : f32 to vector<8x128xf32>
    %15 = arith.cmpf ogt, %1, %14 : vector<8x128xf32>
    %cst_3 = arith.constant 1.000000e+01 : f32
    %16 = vector.broadcast %cst_3 : f32 to vector<8x128xf32>
    %17 = arith.cmpf ole, %1, %16 : vector<8x128xf32>
    %18 = arith.andi %15, %17 : vector<8x128xi1>
    %19 = arith.extui %18 : vector<8x128xi1> to vector<8x128xi32>
    %20 = arith.sitofp %19 : vector<8x128xi32> to vector<8x128xf32>
    %21 = arith.mulf %13, %20 : vector<8x128xf32>
    %cst_4 = arith.constant 0.000000e+00 : f32
    %22 = vector.broadcast %cst_4 : f32 to vector<8x128xf32>
    %23 = arith.cmpf ogt, %21, %22 : vector<8x128xf32>
    %cst_5 = arith.constant 1.000000e+00 : f32
    %24 = vector.broadcast %cst_5 : f32 to vector<8x128xf32>
    %25 = arith.select %23, %0, %24 : vector<8x128xi1>, vector<8x128xf32>
    %26 = math.log %25 : vector<8x128xf32>
    %cst_6 = arith.constant 1.000000e+00 : f32
    %27 = vector.broadcast %cst_6 : f32 to vector<8x128xf32>
    %28 = arith.select %23, %1, %27 : vector<8x128xi1>, vector<8x128xf32>
    %29 = math.log %28 : vector<8x128xf32>
    %30 = arith.subf %26, %29 : vector<8x128xf32>
    %31 = arith.mulf %30, %21 : vector<8x128xf32>
    %32 = vector.shape_cast %31 : vector<8x128xf32> to vector<1x8x128xf32>
    %cst_7 = arith.constant dense<0.000000e+00> : vector<8x128xf32>
    %33 = vector.multi_reduction <add>, %32, %cst_7 [0] : vector<1x8x128xf32> to vector<8x128xf32>
    %c0_8 = arith.constant 0 : index
    %c0_9 = arith.constant 0 : index
    %c0_10 = arith.constant 0 : index
    %c0_11 = arith.constant 0 : index
    %34 = vector.load %arg3[%c0_8, %c0_9, %c0_10, %c0_11] : memref<1x3x8x128xf32, #tpu.memory_space<vmem>>, vector<1x1x8x128xf32>
    %35 = vector.shape_cast %34 : vector<1x1x8x128xf32> to vector<8x128xf32>
    %36 = vector.shape_cast %33 : vector<8x128xf32> to vector<1x1x8x128xf32>
    tpu.vector_store %arg3[%c0_8, %c0_9, %c0_10, %c0_11], %36 {strides = array<i32>} : memref<1x3x8x128xf32, #tpu.memory_space<vmem>>, vector<1x1x8x128xf32>,
    %37 = arith.mulf %31, %31 : vector<8x128xf32>
    %38 = vector.shape_cast %37 : vector<8x128xf32> to vector<1x8x128xf32>
    %cst_12 = arith.constant dense<0.000000e+00> : vector<8x128xf32>
    %39 = vector.multi_reduction <add>, %38, %cst_12 [0] : vector<1x8x128xf32> to vector<8x128xf32>
    %c0_13 = arith.constant 0 : index
    %c1 = arith.constant 1 : index
    %c0_14 = arith.constant 0 : index
    %c0_15 = arith.constant 0 : index
    %40 = vector.load %arg3[%c0_13, %c1, %c0_14, %c0_15] : memref<1x3x8x128xf32, #tpu.memory_space<vmem>>, vector<1x1x8x128xf32>
    %41 = vector.shape_cast %40 : vector<1x1x8x128xf32> to vector<8x128xf32>
    %42 = vector.shape_cast %39 : vector<8x128xf32> to vector<1x1x8x128xf32>
    tpu.vector_store %arg3[%c0_13, %c1, %c0_14, %c0_15], %42 {strides = array<i32>} : memref<1x3x8x128xf32, #tpu.memory_space<vmem>>, vector<1x1x8x128xf32>,
    %43 = vector.shape_cast %21 : vector<8x128xf32> to vector<1x8x128xf32>
    %cst_16 = arith.constant dense<0.000000e+00> : vector<8x128xf32>
    %44 = vector.multi_reduction <add>, %43, %cst_16 [0] : vector<1x8x128xf32> to vector<8x128xf32>
    %c0_17 = arith.constant 0 : index
    %c2 = arith.constant 2 : index
    %c0_18 = arith.constant 0 : index
    %c0_19 = arith.constant 0 : index
    %45 = vector.load %arg3[%c0_17, %c2, %c0_18, %c0_19] : memref<1x3x8x128xf32, #tpu.memory_space<vmem>>, vector<1x1x8x128xf32>
    %46 = vector.shape_cast %45 : vector<1x1x8x128xf32> to vector<8x128xf32>
    %47 = vector.shape_cast %44 : vector<8x128xf32> to vector<1x1x8x128xf32>
    tpu.vector_store %arg3[%c0_17, %c2, %c0_18, %c0_19], %47 {strides = array<i32>} : memref<1x3x8x128xf32, #tpu.memory_space<vmem>>, vector<1x1x8x128xf32>,
    return
  }
  func.func @transform_0(%arg0: i32) -> (i32, i32) {
    %c0_i32 = arith.constant 0 : i32
    %c0_i32_0 = arith.constant 0 : i32
    return %arg0, %c0_i32 : i32, i32
  }
  func.func @transform_1(%arg0: i32) -> (i32, i32) {
    %c0_i32 = arith.constant 0 : i32
    %c0_i32_0 = arith.constant 0 : i32
    return %arg0, %c0_i32 : i32, i32
  }
  func.func @transform_2(%arg0: i32) -> (i32, i32, i32, i32) {
    %c0_i32 = arith.constant 0 : i32
    %c0_i32_0 = arith.constant 0 : i32
    %c0_i32_1 = arith.constant 0 : i32
    %c0_i32_2 = arith.constant 0 : i32
    return %arg0, %c0_i32, %c0_i32_0, %c0_i32_1 : i32, i32, i32, i32
  }
}

</mosaic_0001>

<bundles_post_ra>
// kernel: tpu_custom_call.1
= control target key start
LH: loop header
LB: loop body
LE: loop exit
PB: predicated region body
PF: predicated region fallthrough
CT: control target
= control target key end

     0   :  { %7 = vsyncpa [#allocation3], 0  ;;  %s200_s0 = inlined_call_operand.hbm [shape: f32[8,128], index: 0, kind: input, shape index: {}]   ;;  %s201_s1 = inlined_call_operand.hbm [shape: f32[8,128], index: 1, kind: input, shape index: {}]   ;;  %s202_s2 = inlined_call_operand.hbm [shape: f32[1,3,8,128], index: 2, kind: output, shape index: {}]  }
   0x1   :  { %8 = vsyncpa [#allocation6], 0 }
   0x2   :  { %9 = vsyncpa [#allocation4], 0  ;;  %s170_s9 = smov [#allocation2]   ;;  %s171_s11 = smov [#allocation5]  }
   0x3   :  { %s16_s10 = sshll.u32 %s170_s9, 4  ;;  %s26_s12 = sshll.u32 %s171_s11, 4  ;;  %s17_s10 = int_to_ptr.vmem [resolvable:$true] %s16_s10  ;;  %s27_s12 = int_to_ptr.vmem [resolvable:$true] %s26_s12 }
   0x4   :  { %s112_s13 = scalar_lea.vmem %s17_s10, 128  ;;  %p117_p1 = scmp.lt.s32.totalorder %s17_s10, %s17_s10 }
   0x5   :  { %p113_p0 = scmp.ne.s32.totalorder %s17_s10, %s112_s13  ;;  %p118_p2 = scmp.lt.s32.totalorder %s112_s13, %s112_s13 }
   0x7   :  { %p119_p3 = por %p118_p2, %p117_p1 }
   0x9   :  { %p120_p4 = pnand %p119_p3, %p113_p0 }
   0xb   :  { %123 = shalt.err (!%p120_p4)
}
   0xc   :  { %19 = dma.hbm_to_vmem [thread:$0]  %s200_s0, 128, %s17_s10, [#allocation3]  }
   0xd   :  { %s132_s16 = scalar_lea.vmem %s27_s12, 128  ;;  %p137_p6 = scmp.lt.s32.totalorder %s27_s12, %s27_s12 }
   0xe   :  { %p133_p5 = scmp.ne.s32.totalorder %s27_s12, %s132_s16  ;;  %p138_p7 = scmp.lt.s32.totalorder %s132_s16, %s132_s16 }
  0x10   :  { %p139_p8 = por %p138_p7, %p137_p6 }
  0x12   :  { %p140_p9 = pnand %p139_p8, %p133_p5 }
  0x14   :  { %143 = shalt.err (!%p140_p9)
}
  0x15   :  { %29 = dma.hbm_to_vmem [thread:$0]  %s201_s1, 128, %s27_s12, [#allocation6]  }
  0x16   :  { %164 = dma.done.wait [#allocation3], 128  }
  0x17   :  { %165 = vsyncadd [#allocation3], 4294967168 }
  0x18   :  { %166 = dma.done.wait [#allocation6], 128  }
  0x19   :  { %167 = vsyncadd [#allocation6], 4294967168  ;;  %v39_v0 = vlaneseq  ;;  %v37_v5 = vld [vmem:[#allocation5] sm:$0xff]  ;;  %v172_v6 = vmov 0.0   ;;  %v36_v9 = vld [vmem:[#allocation2] sm:$0xff]  ;;  %s173_s0 = smov [#allocation7]  }
  0x1a   :  { %vm50_vm1 = vcmp.gt.f32.partialorder %v37_v5, 0.0  ;;  %vm51_vm2 = vcmp.le.f32.partialorder %v37_v5, 10.0  ;;  %s79_s1 = sshll.u32 %s173_s0, 4  ;;  %s80_s1 = int_to_ptr.vmem [resolvable:$true] %s79_s1 }
  0x1b   :  { %v40_v1 = vshrl.u32 %v39_v0, 7  ;;  %v42_v2 = vand.u32 127, %v39_v0  ;;  %vm52_vm3 = vmand %vm50_vm1, %vm51_vm2  ;;  %s144_s19 = scalar_lea.vmem %s80_s1, 384  ;;  %p149_p11 = scmp.lt.s32.totalorder %s80_s1, %s80_s1 }
  0x1c   :  { %v93_v8 = vsel %vm52_vm3, 1.0, %v172_v6  ;;  %p145_p10 = scmp.ne.s32.totalorder %s80_s1, %s144_s19  ;;  %p150_p12 = scmp.lt.s32.totalorder %s144_s19, %s144_s19 }
  0x1d   :  { %v43_v3 = vmul.u32 128, %v40_v1 }
  0x1e   :  { %p151_p13 = por %p150_p12, %p149_p11 }
  0x1f   :  { %v46_v4 = vadd.s32 %v43_v3, %v42_v2 }
  0x20   :  { %p152_p0 = pnand %p151_p13, %p145_p10 }
  0x21   :  { %vm47_vm0 = vcmp.lt.s32.totalorder %v46_v4, 512 }
  0x22   :  { %v92_v7 = vsel %vm47_vm0, 1.0, %v172_v6 }
  0x23   :  { %v55_v10 = vmul.f32 %v93_v8, %v92_v7 }
  0x25   :  { %vm56_vm4 = vcmp.gt.f32.partialorder %v55_v10, 0.0  ;;  %73 = vst [vmem:[#allocation7 + $0x10] sm:$0xff] %v55_v10 }
  0x26   :  { %v57_v11 = vsel %vm56_vm4, %v36_v9, 1.0  ;;  %v60_v12 = vsel %vm56_vm4, %v37_v5, 1.0 }
  0x27   :  { %100 = vlog2.f32 %v57_v11 }
  0x28   :  { %102 = vlog2.f32 %v60_v12 }
  0x34   :  { %v101_v13 = vpop.eup %100 }
  0x35   :  { %v103_v14 = vpop.eup %102  ;;  %v59_v15 = vmul.f32 0.6931472, %v101_v13 }
  0x36   :  { %v62_v16 = vmul.f32 0.6931472, %v103_v14 }
  0x38   :  { %v63_v17 = vsub.f32 %v59_v15, %v62_v16 }
  0x3a   :  { %v64_v18 = vmul.f32 %v63_v17, %v55_v10 }
  0x3c   :  { %66 = vst [vmem:[#allocation7] sm:$0xff] %v64_v18  ;;  %v67_v19 = vmul.f32 %v64_v18, %v64_v18 }
  0x3e   :  { %70 = vst [vmem:[#allocation7 + $0x8] sm:$0xff] %v67_v19 }
  0x3f   :  { %155 = shalt.err (!%p152_p0)
}
  0x40   :  { %s174_s20 = smov 128   ;;  %s175_s21 = smov 8  }
  0x41   :  { %85 = dma.vmem_to_hbm [thread:$0]  %s80_s1, 384, %s202_s2, [#allocation4], %s174_s20, %s174_s20, %s175_s21  }
  0x42   :  { %168 = dma.done.wait [#allocation4], 384  }
  0x43   :  { %169 = vsyncadd [#allocation4], 4294966912 }
  0x44   :  { %89 = vsyncpa [#allocation3], 1 }
  0x45   :  { %90 = vsyncpa [#allocation6], 1 }
  0x46   :  { %91 = vsyncpa [#allocation4], 1 }

</bundles_post_ra>
